<compile_context>
chip_gen: v7x
topology: tpu7x:2x2x1
jax: 0.10.0
libtpu: 0.0.40
codegen_flags: <defaults>
</compile_context>

<pallas_src>
from functools import partial

import jax
import jax.numpy as jnp
import numpy as np
from jax.experimental import pallas as pl
from jax.experimental.pallas import tpu as pltpu

_LANE = 128


def _round_up(a: int, b: int) -> int:
    return ((a + b - 1) // b) * b


def finer_kernel(x_ref, o_ref, *, w0):
    """One grid step = one lane-dense (block_rows, 128) tile."""
    x = x_ref[...].astype(jnp.float32)
    scale = jnp.abs(x) + 1.0              # torch.no_grad() only affects grads
    o_ref[...] = jnp.sin(w0 * scale * x).astype(o_ref.dtype)


def finer_forward(x, w0=20.0, *, max_block_rows=1024):
    """JAX wrapper reproducing Finer(w0).forward(x) for arbitrary-shaped x."""
    orig_shape = x.shape
    orig_dtype = x.dtype
    n = int(np.prod(orig_shape)) if orig_shape else 1

    # Flatten to a lane-dense (rows, 128) layout.
    rows = _round_up(n, _LANE) // _LANE            # cdiv(n, 128)
    rows8 = _round_up(max(rows, 1), 8)             # sublane multiple of 8
    block_rows = _round_up(min(max_block_rows, rows8), 8)
    padded_rows = _round_up(rows8, block_rows)
    padded_n = padded_rows * _LANE

    x_flat = jnp.ravel(x)
    if padded_n != n:
        x_flat = jnp.pad(x_flat, (0, padded_n - n))
    x2d = x_flat.reshape(padded_rows, _LANE)

    grid = (padded_rows // block_rows,)

    out2d = pl.pallas_call(
        partial(finer_kernel, w0=float(w0)),
        out_shape=jax.ShapeDtypeStruct((padded_rows, _LANE), orig_dtype),
        grid_spec=pl.GridSpec(
            grid=grid,
            in_specs=[pl.BlockSpec((block_rows, _LANE), lambda i: (i, 0))],
            out_specs=pl.BlockSpec((block_rows, _LANE), lambda i: (i, 0)),
        ),
        compiler_params=pltpu.CompilerParams(
            dimension_semantics=("parallel",),
            vmem_limit_bytes=64 * 1024 * 1024,
        ),
    )(x2d)

    return out2d.reshape(-1)[:n].reshape(orig_shape)


def finer_reference(x, w0=20.0):
    """Pure-JAX reference for correctness checking."""
    x32 = x.astype(jnp.float32)
    return jnp.sin(w0 * (jnp.abs(x32) + 1.0) * x32).astype(x.dtype)


if __name__ == "__main__":
    # Small input consistent with using Finer as an activation inside a net.
    key = jax.random.PRNGKey(0)
    x = jax.random.uniform(key, (2, 4, 16, 16), jnp.float32,
                           minval=-1.0, maxval=1.0)
    w0 = 20.0

    out = finer_forward(x, w0)
    jax.block_until_ready(out)

    ref = finer_reference(x, w0)
    np.testing.assert_allclose(np.asarray(out), np.asarray(ref),
                               rtol=1e-5, atol=1e-5)
    print("KERNEL_OK")
</pallas_src>

<mosaic_0001>
module attributes {stable_mosaic.version = 11 : i64} {
  func.func @finer_kernel(%arg0: i32, %arg1: memref<16x128xf32, #tpu.memory_space<vmem>>, %arg2: memref<16x128xf32, #tpu.memory_space<vmem>>) attributes {dimension_semantics = [#tpu.dimension_semantics<parallel>], iteration_bounds = array<i64: 1>, scalar_prefetch = 0 : i64, scratch_operands = 0 : i64, tpu.core_type = #tpu.core_type<tc>, window_params = [{transform_indices = @transform_0, window_bounds = array<i64: 16, 128>}, {transform_indices = @transform_1, window_bounds = array<i64: 16, 128>}]} {
    %c0 = arith.constant 0 : index
    %c0_0 = arith.constant 0 : index
    %0 = vector.load %arg1[%c0, %c0_0] : memref<16x128xf32, #tpu.memory_space<vmem>>, vector<16x128xf32>
    %1 = math.absf %0 : vector<16x128xf32>
    %cst = arith.constant 1.000000e+00 : f32
    %2 = vector.broadcast %cst : f32 to vector<16x128xf32>
    %3 = arith.addf %1, %2 : vector<16x128xf32>
    %cst_1 = arith.constant 2.000000e+01 : f32
    %4 = vector.broadcast %cst_1 : f32 to vector<16x128xf32>
    %5 = arith.mulf %4, %3 : vector<16x128xf32>
    %6 = arith.mulf %5, %0 : vector<16x128xf32>
    %7 = math.sin %6 : vector<16x128xf32>
    %c0_2 = arith.constant 0 : index
    %c0_3 = arith.constant 0 : index
    %8 = vector.load %arg2[%c0_2, %c0_3] : memref<16x128xf32, #tpu.memory_space<vmem>>, vector<16x128xf32>
    tpu.vector_store %arg2[%c0_2, %c0_3], %7 {strides = array<i32>} : memref<16x128xf32, #tpu.memory_space<vmem>>, vector<16x128xf32>,
    return
  }
  func.func @transform_0(%arg0: i32) -> (i32, i32) {
    %c0_i32 = arith.constant 0 : i32
    %c0_i32_0 = arith.constant 0 : i32
    return %arg0, %c0_i32 : i32, i32
  }
  func.func @transform_1(%arg0: i32) -> (i32, i32) {
    %c0_i32 = arith.constant 0 : i32
    %c0_i32_0 = arith.constant 0 : i32
    return %arg0, %c0_i32 : i32, i32
  }
}

</mosaic_0001>

<bundles_post_ra>
// kernel: tpu_custom_call.1
= control target key start
LH: loop header
LB: loop body
LE: loop exit
PB: predicated region body
PF: predicated region fallthrough
CT: control target
= control target key end

     0   :  { %6 = vsyncpa [#allocation3], 0  ;;  %s462_s0 = inlined_call_operand.hbm [shape: f32[16,128], index: 0, kind: input, shape index: {}]   ;;  %s463_s1 = inlined_call_operand.hbm [shape: f32[16,128], index: 1, kind: output, shape index: {}]  }
   0x1   :  { %7 = vsyncpa [#allocation4], 0  ;;  %s342_s6 = smov [#allocation2]   ;;  %s294_s10 = scalar_lea.hbm %s462_s0, 256 }
   0x2   :  { %s13_s7 = sshll.u32 %s342_s6, 4  ;;  %p295_p0 = scmp.ne.s32.totalorder %s462_s0, %s294_s10  ;;  %s14_s7 = int_to_ptr.vmem [resolvable:$true] %s13_s7 }
   0x3   :  { %p298_p1 = scmp.lt.u32.totalorder %s294_s10, %s462_s0 }
   0x5   :  { %p300_p2 = pnand %p298_p1, %p295_p0 }
   0x7   :  { %303 = shalt.err (!%p300_p2)
}
   0x8   :  { %s304_s15 = scalar_lea.vmem %s14_s7, 256  ;;  %p309_p4 = scmp.lt.s32.totalorder %s14_s7, %s14_s7 }
   0x9   :  { %p305_p3 = scmp.ne.s32.totalorder %s14_s7, %s304_s15  ;;  %p310_p5 = scmp.lt.s32.totalorder %s304_s15, %s304_s15 }
   0xb   :  { %p311_p6 = por %p310_p5, %p309_p4 }
   0xd   :  { %p312_p7 = pnand %p311_p6, %p305_p3 }
   0xf   :  { %315 = shalt.err (!%p312_p7)
}
  0x10   :  { %s343_s16 = smov 128   ;;  %s344_s17 = smov 8  }
  0x11   :  { %19 = dma.hbm_to_vmem [thread:$0]  %s462_s0, 256, %s14_s7, [#allocation3], %s343_s16, %s343_s16, %s344_s17  }
  0x12   :  { %338 = dma.done.wait [#allocation3], 256  }
  0x13   :  { %339 = vsyncadd [#allocation3], 4294967040  ;;  %v23_v0 = vld [vmem:[#allocation2] sm:$0xff]  ;;  %v24_v1 = vld [vmem:[#allocation2 + $0x8] sm:$0xff]  ;;  %v345_v32 = vmov 683565275  }
  0x14   :  { %v25_v2 = vand.u32 2147483647, %v23_v0  ;;  %v26_v3 = vand.u32 2147483647, %v24_v1  ;;  %v346_v34 = vmov 2475754826  }
  0x15   :  { %v347_v36 = vmov 2131351028   ;;  %v348_v38 = vmov 2102212464   ;;  %v349_v40 = vmov 920167782  }
  0x16   :  { %v27_v4 = vadd.f32 1.0, %v25_v2  ;;  %v28_v5 = vadd.f32 1.0, %v26_v3  ;;  %v350_v48 = vmov 1326507024   ;;  %s351_s0 = smov [#allocation5]  }
  0x17   :  { %s248_s20 = sshll.u32 %s351_s0, 4  ;;  %s249_s20 = int_to_ptr.vmem [resolvable:$true] %s248_s20 }
  0x18   :  { %v29_v6 = vmul.f32 20.0, %v27_v4  ;;  %v30_v7 = vmul.f32 20.0, %v28_v5  ;;  %s316_s21 = scalar_lea.vmem %s249_s20, 256  ;;  %p321_p9 = scmp.lt.s32.totalorder %s249_s20, %s249_s20 }
  0x19   :  { %p317_p8 = scmp.ne.s32.totalorder %s249_s20, %s316_s21  ;;  %p322_p10 = scmp.lt.s32.totalorder %s316_s21, %s316_s21 }
  0x1a   :  { %v377_v8 = vmul.f32 %v29_v6, %v23_v0  ;;  %v379_v9 = vmul.f32 %v30_v7, %v24_v1 }
  0x1b   :  { %p323_p11 = por %p322_p10, %p321_p9 }
  0x1c   :  { %v33_v10 = vand.u32 2147483647, %v377_v8  ;;  %v36_v11 = vand.u32 2139095040, %v377_v8  ;;  %v137_v12 = vand.u32 2147483647, %v379_v9  ;;  %v140_v13 = vand.u32 2139095040, %v379_v9 }
  0x1d   :  { %vm35_vm14 = vcmp.lt.s32.totalorder %v377_v8, 0  ;;  %p324_p12 = pnand %p323_p11, %p317_p8 }
  0x1e   :  { %v37_v14 = vshrl.u32 %v36_v11, 23  ;;  %v40_v15 = vand.u32 8388607, %v33_v10  ;;  %v141_v16 = vshrl.u32 %v140_v13, 23  ;;  %v144_v17 = vand.u32 8388607, %v137_v12 }
  0x1f   :  { %vm34_vm15 = vcmp.le.f32.partialorder %v33_v10, 0.7853982 }
  0x20   :  { %v260_v18 = vadd.s32 4294967169, %v37_v14  ;;  %v264_v19 = vadd.s32 4294967169, %v141_v16  ;;  %v41_v21 = vor.u32 8388608, %v40_v15  ;;  %v145_v22 = vor.u32 8388608, %v144_v17 }
  0x22   :  { %v43_v20 = vadd.s32 1, %v260_v18  ;;  %v147_v23 = vadd.s32 1, %v264_v19  ;;  %v389_v28 = vshll.u32 %v41_v21, 8  ;;  %v391_v30 = vshll.u32 %v145_v22, 8 }
  0x24   :  { %vm44_vm0 = vcmp.gt.s32.totalorder %v43_v20, 0  ;;  %vm148_vm1 = vcmp.gt.s32.totalorder %v147_v23, 0 }
  0x25   :  { %v45_v24 = vsel %vm44_vm0, %v43_v20, 0  ;;  %v149_v27 = vsel %vm148_vm1, %v147_v23, 0  ;;  %vm139_vm0 = vcmp.lt.s32.totalorder %v379_v9, 0  ;;  %vm138_vm1 = vcmp.le.f32.partialorder %v137_v12, 0.7853982 }
  0x26   :  { %v46_v25 = vshrl.u32 %v45_v24, 5  ;;  %v47_v26 = vand.u32 31, %v45_v24  ;;  %v151_v29 = vand.u32 31, %v149_v27  ;;  %v393_v42 = vshrl.u32 %v149_v27, 5 }
  0x28   :  { %v48_v31 = vsub.s32 32, %v47_v26  ;;  %v50_v33 = vshll.u32 %v345_v32, %v47_v26  ;;  %v53_v35 = vshll.u32 %v346_v34, %v47_v26  ;;  %v56_v37 = vshll.u32 %v347_v36, %v47_v26 }
  0x29   :  { %v59_v39 = vshll.u32 %v348_v38, %v47_v26  ;;  %v62_v41 = vshll.u32 %v349_v40, %v47_v26  ;;  %vm65_vm2 = vcmp.lt.s32.totalorder %v46_v25, 1  ;;  %vm66_vm3 = vcmp.lt.s32.totalorder %v46_v25, 2 }
  0x2a   :  { %v49_v43 = vshrl.u32 %v345_v32, %v48_v31  ;;  %v51_v44 = vshrl.u32 %v346_v34, %v48_v31  ;;  %v54_v45 = vshrl.u32 %v347_v36, %v48_v31  ;;  %v57_v46 = vshrl.u32 %v348_v38, %v48_v31 }
  0x2b   :  { %v60_v47 = vshrl.u32 %v349_v40, %v48_v31  ;;  %v63_v49 = vshrl.u32 %v350_v48, %v48_v31  ;;  %vm68_vm4 = vcmp.lt.s32.totalorder %v46_v25, 4  ;;  %v152_v53 = vsub.s32 32, %v151_v29 }
  0x2c   :  { %v52_v50 = vor.u32 %v51_v44, %v50_v33  ;;  %v55_v51 = vor.u32 %v54_v45, %v53_v35  ;;  %v58_v52 = vor.u32 %v57_v46, %v56_v37  ;;  %vm67_vm5 = vcmp.lt.s32.totalorder %v46_v25, 3 }
  0x2d   :  { %v61_v54 = vor.u32 %v60_v47, %v59_v39  ;;  %v64_v55 = vor.u32 %v63_v49, %v62_v41  ;;  %v154_v56 = vshll.u32 %v345_v32, %v151_v29  ;;  %v157_v0 = vshll.u32 %v346_v34, %v151_v29 }
  0x2e   :  { %v69_v57 = vsel %vm65_vm2, %v49_v43, %v52_v50  ;;  %v70_v58 = vsel %vm68_vm4, %v58_v52, 2102212464  ;;  %v73_v59 = vsel %vm65_vm2, %v52_v50, %v55_v51  ;;  %v77_v60 = vsel %vm65_vm2, %v55_v51, %v58_v52 }
  0x2f   :  { %v71_v61 = vsel %vm67_vm5, %v55_v51, %v70_v58  ;;  %v74_v62 = vsel %vm68_vm4, %v61_v54, 920167782  ;;  %v78_v63 = vsel %vm68_vm4, %v64_v55, 1326507024  ;;  %v153_v3 = vshrl.u32 %v345_v32, %v152_v53 }
  0x30   :  { %v75_v1 = vsel %vm67_vm5, %v58_v52, %v74_v62  ;;  %v79_v2 = vsel %vm67_vm5, %v61_v54, %v78_v63  ;;  %v155_v4 = vshrl.u32 %v346_v34, %v152_v53  ;;  %v72_v5 = vsel %vm66_vm3, %v69_v57, %v71_v61 }
  0x31   :  { %v76_v6 = vsel %vm66_vm3, %v73_v59, %v75_v1  ;;  %v80_v7 = vsel %vm66_vm3, %v77_v60, %v79_v2  ;;  %v158_v11 = vshrl.u32 %v347_v36, %v152_v53  ;;  %v160_v19 = vshll.u32 %v347_v36, %v151_v29 }
  0x32   :  { %v402_v13 = vmul.u32.u64.low %v389_v28, %v80_v7  ;;  %v403_v14 = vmul.u32.u64.high %v389_v28, %v80_v7, %v402_v13  ;;  %v406_v15 = vmul.u32.u64.low %v389_v28, %v76_v6  ;;  %v407_v16 = vmul.u32.u64.high %v389_v28, %v76_v6, %v406_v15 }
  0x33   :  { %v156_v17 = vor.u32 %v155_v4, %v154_v56  ;;  %v159_v18 = vor.u32 %v158_v11, %v157_v0  ;;  %v161_v20 = vshrl.u32 %v348_v38, %v152_v53  ;;  %v163_v21 = vshll.u32 %v348_v38, %v151_v29 }
  0x34   :  { %v164_v22 = vshrl.u32 %v349_v40, %v152_v53  ;;  %v166_v23 = vshll.u32 %v349_v40, %v151_v29  ;;  %v167_v24 = vshrl.u32 %v350_v48, %v152_v53  ;;  %v88_v25 = vmul.u32 %v389_v28, %v72_v5 }
  0x35   :  { %v162_v26 = vor.u32 %v161_v20, %v160_v19  ;;  %vm169_vm6 = vcmp.lt.s32.totalorder %v393_v42, 1  ;;  %vm170_vm7 = vcmp.lt.s32.totalorder %v393_v42, 2  ;;  %vm90_vm8 = vc.u32 %v403_v14, %v406_v15 }
  0x36   :  { %v91_v27 = vadd.s32 1, %v407_v16  ;;  %v165_v31 = vor.u32 %v164_v22, %v163_v21  ;;  %vm171_vm9 = vcmp.lt.s32.totalorder %v393_v42, 3  ;;  %v168_v32 = vor.u32 %v167_v24, %v166_v23 }
  0x37   :  { %vm172_vm10 = vcmp.lt.s32.totalorder %v393_v42, 4  ;;  %v173_v33 = vsel %vm169_vm6, %v153_v3, %v156_v17  ;;  %v177_v29 = vsel %vm169_vm6, %v156_v17, %v159_v18  ;;  %v181_v36 = vsel %vm169_vm6, %v159_v18, %v162_v26 }
  0x38   :  { %v92_v34 = vsel %vm90_vm8, %v91_v27, %v407_v16  ;;  %v174_v28 = vsel %vm172_vm10, %v162_v26, 2102212464  ;;  %v178_v35 = vsel %vm172_vm10, %v165_v31, 920167782  ;;  %v182_v40 = vsel %vm172_vm10, %v168_v32, 1326507024 }
  0x39   :  { %v93_v37 = vadd.s32 %v92_v34, %v88_v25  ;;  %v175_v38 = vsel %vm171_vm9, %v159_v18, %v174_v28  ;;  %v179_v39 = vsel %vm171_vm9, %v162_v26, %v178_v35  ;;  %v183_v44 = vsel %vm171_vm9, %v165_v31, %v182_v40 }
  0x3a   :  { %v176_v41 = vsel %vm170_vm7, %v173_v33, %v175_v38  ;;  %v180_v43 = vsel %vm170_vm7, %v177_v29, %v179_v39  ;;  %v184_v46 = vsel %vm170_vm7, %v181_v36, %v183_v44  ;;  %v89_v1 = vadd.s32 %v406_v15, %v403_v14 }
  0x3b   :  { %v94_v45 = vadd.s32 536870912, %v93_v37  ;;  %v424_v47 = vmul.u32.u64.low %v391_v30, %v180_v43  ;;  %v425_v48 = vmul.u32.u64.high %v391_v30, %v180_v43, %v424_v47  ;;  %v192_v52 = vmul.u32 %v391_v30, %v176_v41 }
  0x3c   :  { %v428_v49 = vmul.u32.u64.low %v391_v30, %v184_v46  ;;  %v429_v50 = vmul.u32.u64.high %v391_v30, %v184_v46, %v428_v49  ;;  %vm125_vm5 = vweird.f32 %v377_v8  ;;  %vm229_vm9 = vweird.f32 %v379_v9 }
  0x3d   :  { %v95_v51 = vshrl.u32 %v94_v45, 30  ;;  %v195_v54 = vadd.s32 1, %v425_v48 }
  0x3e   :  { %vm194_vm11 = vc.u32 %v429_v50, %v424_v47  ;;  %v193_v21 = vadd.s32 %v424_v47, %v429_v50 }
  0x3f   :  { %v96_v53 = vshll.u32 %v95_v51, 30  ;;  %v196_v42 = vsel %vm194_vm11, %v195_v54, %v425_v48  ;;  %v119_v14 = vsub.s32 4, %v95_v51 }
  0x40   :  { %v197_v56 = vadd.s32 %v196_v42, %v192_v52 }
  0x41   :  { %v97_v55 = vsub.s32 %v93_v37, %v96_v53  ;;  %v120_v33 = vsel %vm35_vm14, %v119_v14, %v95_v51 }
  0x42   :  { %v198_v58 = vadd.s32 536870912, %v197_v56  ;;  %v122_v36 = vsel %vm34_vm15, 0, %v120_v33 }
  0x43   :  { %v99_v57 = vsub.s32 0, %v97_v55  ;;  %v126_v41 = vadd.s32 3, %v122_v36 }
  0x44   :  { %v199_v60 = vshrl.u32 %v198_v58, 30 }
  0x45   :  { %v261_v59 = vmin.u32 %v99_v57, %v97_v55  ;;  %v127_v45 = vand.u32 3, %v126_v41 }
  0x46   :  { %v200_v62 = vshll.u32 %v199_v60, 30  ;;  %v223_v40 = vsub.s32 4, %v199_v60 }
  0x47   :  { %v101_v61 = vclz %v261_v59  ;;  %vm132_vm2 = vcmp.eq.s32.totalorder %v127_v45, 2  ;;  %vm129_vm3 = vcmp.eq.s32.totalorder %v127_v45, 0  ;;  %vm128_vm4 = vcmp.lt.s32.totalorder %v127_v45, 2 }
  0x48   :  { %v201_v0 = vsub.s32 %v197_v56, %v200_v62  ;;  %v224_v44 = vsel %vm139_vm0, %v223_v40, %v199_v60 }
  0x49   :  { %v262_v63 = vadd.s32 4294967294, %v101_v61  ;;  %v226_v48 = vsel %vm138_vm1, 0, %v224_v44 }
  0x4a   :  { %v203_v2 = vsub.s32 0, %v201_v0  ;;  %v230_v52 = vadd.s32 3, %v226_v48 }
  0x4b   :  { %vm263_vm12 = vcmp.lt.s32.totalorder %v262_v63, 0 }
  0x4c   :  { %v104_v30 = vsel %vm263_vm12, 0, %v262_v63  ;;  %v265_v6 = vmin.u32 %v203_v2, %v201_v0  ;;  %v231_v42 = vand.u32 3, %v230_v52 }
  0x4d   :  { %v105_v3 = vsub.s32 32, %v104_v30  ;;  %v106_v4 = vshll.u32 %v97_v55, %v104_v30  ;;  %v109_v5 = vsub.s32 4294967266, %v104_v30 }
  0x4e   :  { %v205_v13 = vclz %v265_v6  ;;  %vm236_vm6 = vcmp.eq.s32.totalorder %v231_v42, 2  ;;  %vm233_vm7 = vcmp.eq.s32.totalorder %v231_v42, 0  ;;  %vm232_vm8 = vcmp.lt.s32.totalorder %v231_v42, 2 }
  0x4f   :  { %v107_v7 = vshrl.u32 %v89_v1, %v105_v3  ;;  %v110_v11 = vadd.s32 127, %v109_v5 }
  0x50   :  { %v266_v18 = vadd.s32 4294967294, %v205_v13 }
  0x51   :  { %v108_v16 = vor.u32 %v107_v7, %v106_v4  ;;  %v111_v17 = vshll.u32 %v110_v11, 23 }
  0x52   :  { %vm267_vm13 = vcmp.lt.s32.totalorder %v266_v18, 0 }
  0x53   :  { %v112_v19 = vor.u32 4788187, %v111_v17  ;;  %v115_v20 = vcvt.s32.f32 %v108_v16  ;;  %v208_v15 = vsel %vm267_vm13, 0, %v266_v18 }
  0x54   :  { %v209_v23 = vsub.s32 32, %v208_v15  ;;  %v210_v24 = vshll.u32 %v201_v0, %v208_v15  ;;  %v213_v25 = vsub.s32 4294967266, %v208_v15 }
  0x55   :  { %v113_v22 = vand.u32 2147483647, %v112_v19 }
  0x56   :  { %v211_v27 = vshrl.u32 %v193_v21, %v209_v23  ;;  %v214_v31 = vadd.s32 127, %v213_v25 }
  0x57   :  { %v116_v26 = vmul.f32 %v115_v20, %v113_v22 }
  0x58   :  { %v212_v29 = vor.u32 %v211_v27, %v210_v24  ;;  %v215_v34 = vshll.u32 %v214_v31, 23 }
  0x59   :  { %v117_v32 = vxor.u32 2147483648, %v116_v26 }
  0x5a   :  { %v216_v37 = vor.u32 4788187, %v215_v34  ;;  %v219_v38 = vcvt.s32.f32 %v212_v29 }
  0x5b   :  { %v118_v28 = vsel %vm35_vm14, %v117_v32, %v116_v26 }
  0x5c   :  { %v121_v35 = vsel %vm34_vm15, %v377_v8, %v118_v28  ;;  %v217_v39 = vand.u32 2147483647, %v216_v37 }
  0x5d   :  { %286 = vcosq.f32 %v121_v35 }
  0x5e   :  { %288 = vsinq.f32 %v121_v35  ;;  %v220_v43 = vmul.f32 %v219_v38, %v217_v39 }
  0x60   :  { %v221_v10 = vxor.u32 2147483648, %v220_v43 }
  0x62   :  { %v222_v46 = vsel %vm139_vm0, %v221_v10, %v220_v43 }
  0x63   :  { %v225_v47 = vsel %vm138_vm1, %v379_v9, %v222_v46 }
  0x64   :  { %290 = vcosq.f32 %v225_v47 }
  0x65   :  { %292 = vsinq.f32 %v225_v47 }
  0x67   :  { %v287_v49 = vpop.eup %286 }
  0x68   :  { %v289_v50 = vpop.eup %288  ;;  %v133_v51 = vxor.u32 2147483648, %v287_v49 }
  0x69   :  { %v130_v53 = vxor.u32 2147483648, %v289_v50 }
  0x6a   :  { %v134_v12 = vsel %vm132_vm2, %v133_v51, %v289_v50 }
  0x6b   :  { %v131_v54 = vsel %vm129_vm3, %v287_v49, %v130_v53 }
  0x6c   :  { %v135_v55 = vsel %vm128_vm4, %v131_v54, %v134_v12 }
  0x6d   :  { %v136_v56 = vsel %vm125_vm5, nan, %v135_v55 }
  0x6e   :  { %241 = vst [vmem:[#allocation5] sm:$0xff] %v136_v56  ;;  %v291_v57 = vpop.eup %290 }
  0x6f   :  { %v293_v58 = vpop.eup %292  ;;  %v237_v59 = vxor.u32 2147483648, %v291_v57 }
  0x70   :  { %v234_v60 = vxor.u32 2147483648, %v293_v58 }
  0x71   :  { %v238_v61 = vsel %vm236_vm6, %v237_v59, %v293_v58 }
  0x72   :  { %v235_v62 = vsel %vm233_vm7, %v291_v57, %v234_v60 }
  0x73   :  { %v239_v8 = vsel %vm232_vm8, %v235_v62, %v238_v61 }
  0x74   :  { %v240_v63 = vsel %vm229_vm9, nan, %v239_v8 }
  0x75   :  { %242 = vst [vmem:[#allocation5 + $0x8] sm:$0xff] %v240_v63 }
  0x76   :  { %327 = shalt.err (!%p324_p12)
}
  0x77   :  { %s328_s24 = scalar_lea.hbm %s463_s1, 256 }
  0x78   :  { %p329_p13 = scmp.ne.s32.totalorder %s463_s1, %s328_s24  ;;  %p332_p0 = scmp.lt.u32.totalorder %s328_s24, %s463_s1 }
  0x7a   :  { %p334_p1 = pnand %p332_p0, %p329_p13 }
  0x7c   :  { %337 = shalt.err (!%p334_p1)
}
  0x7d   :  { %254 = dma.vmem_to_hbm [thread:$0]  %s249_s20, 256, %s463_s1, [#allocation4], %s343_s16, %s343_s16, %s344_s17  }
  0x7e   :  { %340 = dma.done.wait [#allocation4], 256  }
  0x7f   :  { %341 = vsyncadd [#allocation4], 4294967040 }
  0x80   :  { %258 = vsyncpa [#allocation3], 1 }
  0x81   :  { %259 = vsyncpa [#allocation4], 1 }

</bundles_post_ra>
